<compile_context>
chip_gen: v7x
topology: tpu7x:2x2x1
jax: 0.10.0
libtpu: 0.0.40
codegen_flags: <defaults>
</compile_context>

<pallas_src>
import functools

import jax
import jax.numpy as jnp
from jax.experimental import pallas as pl
from jax.experimental.pallas import tpu as pltpu

_TARGET_BLOCK_BYTES = 8 * 1024 * 1024       # ~8 MiB streaming blocks
_WIDTH_CANDIDATES = (1024, 512, 256, 128)   # lane-dense widths (multiples of 128)
_LANE = 128
_SUBLANE = 8
_VMEM_LIMIT_BYTES = 40 * 1024 * 1024        # 2 bufs x (in+out) x 8 MiB = 32 MiB


def _pact_quant_kernel(params_ref, x_ref, o_ref, *, dequantize):
    # params_ref: (2,) f32 in SMEM -> [clip_val, scale]
    clip_val = params_ref[0]
    scale = params_ref[1]

    x = x_ref[...].astype(jnp.float32)

    # relu + clamp to [0, clip_val]
    y = jnp.minimum(jnp.maximum(x, 0.0), clip_val)

    # linear quantize (zero_point == 0), optional dequantize
    q = jnp.round(y * scale)
    if dequantize:
        q = q / scale           # matches distiller's q / scale exactly

    o_ref[...] = q.astype(o_ref.dtype)


def _quant_jnp(x, clip_val, scale, dequantize, out_dtype):
    """Plain-jnp path for the (tiny, <width-element) ragged tail."""
    y = jnp.minimum(jnp.maximum(x.astype(jnp.float32), 0.0), clip_val)
    q = jnp.round(y * scale)
    if dequantize:
        q = q / scale
    return q.astype(out_dtype)


def _choose_width(total):
    """Largest lane-dense width that divides `total`; else 1024 (or 128)."""
    for w in _WIDTH_CANDIDATES:
        if total % w == 0:
            return w
    return _WIDTH_CANDIDATES[0] if total >= _WIDTH_CANDIDATES[0] else _LANE


@functools.partial(jax.jit, static_argnames=("num_bits", "dequantize"))
def learned_clipped_linear_quantization(x, clip_val, *, num_bits=8,
                                        dequantize=True):
    """LearnedClippedLinearQuantization forward (elementwise, any shape)."""
    orig_shape = x.shape
    orig_dtype = x.dtype

    flat = x.reshape(-1)
    total = flat.shape[0]

    # Hoist all scalar math out of the kernel.  Guard against a learned
    # clip value drifting non-positive (would give inf / NaN scale).
    clip_f32 = jnp.maximum(jnp.asarray(clip_val, jnp.float32).reshape(()),
                           jnp.float32(1e-8))
    n_levels = jnp.float32((1 << num_bits) - 1)
    scale = n_levels / clip_f32
    params = jnp.stack([clip_f32, scale])          # (2,) f32, lives in SMEM

    width = _choose_width(total)
    main = (total // width) * width
    tail = total - main

    pieces = []
    if main:
        rows = main // width
        x2d = jax.lax.slice(flat, (0,), (main,)).reshape(rows, width)

        # Byte-based block sizing: same fraction of HBM roofline for any dtype.
        itemsize = jnp.dtype(orig_dtype).itemsize
        block_rows = max(_SUBLANE,
                         (_TARGET_BLOCK_BYTES // (width * itemsize))
                         // _SUBLANE * _SUBLANE)
        block_rows = min(rows, block_rows)          # full extent if array small
        grid = pl.cdiv(rows, block_rows)            # partial last block is masked

        out2d = pl.pallas_call(
            functools.partial(_pact_quant_kernel, dequantize=dequantize),
            out_shape=jax.ShapeDtypeStruct((rows, width), orig_dtype),
            grid=(grid,),
            in_specs=[
                pl.BlockSpec(memory_space=pltpu.MemorySpace.SMEM),    # params
                pl.BlockSpec((block_rows, width), lambda i: (i, 0)),  # x tile
            ],
            out_specs=pl.BlockSpec((block_rows, width), lambda i: (i, 0)),
            compiler_params=pltpu.CompilerParams(
                dimension_semantics=("parallel",),
                vmem_limit_bytes=_VMEM_LIMIT_BYTES,
            ),
        )(params, x2d)
        pieces.append(out2d.reshape(-1))

    if tail:
        xt = jax.lax.slice(flat, (main,), (total,))
        pieces.append(_quant_jnp(xt, clip_f32, scale, dequantize, orig_dtype))

    out = pieces[0] if len(pieces) == 1 else jnp.concatenate(pieces)
    return out.reshape(orig_shape)


def _reference(x, clip_val, num_bits, dequantize=True):
    y = jnp.maximum(x.astype(jnp.float32), 0.0)
    y = jnp.minimum(y, jnp.float32(clip_val))
    scale = jnp.float32((1 << num_bits) - 1) / jnp.float32(clip_val)
    q = jnp.round(scale * y)
    if dequantize:
        q = q / scale
    return q.astype(x.dtype)


if __name__ == "__main__":
    key = jax.random.PRNGKey(0)

    # Module "parameters" (matching __init__ signature).
    num_bits = 8
    init_act_clip_val = 6.0   # nn.Parameter(torch.Tensor([init_act_clip_val]))
    clip_val = jnp.float32(init_act_clip_val)

    # Primary example: conv activation, NCHW.
    x = jax.random.normal(key, (2, 4, 16, 16), dtype=jnp.float32) * 4.0
    out = learned_clipped_linear_quantization(
        x, clip_val, num_bits=num_bits, dequantize=True)
    out = jax.block_until_ready(out)
    ref = _reference(x, clip_val, num_bits, dequantize=True)
    assert out.shape == x.shape and out.dtype == x.dtype
    assert jnp.allclose(out, ref, atol=1e-5, rtol=1e-5), "mismatch (main)"

    # Extra checks: ragged element count (jnp-tail path), larger slab, bf16.
    checks = [((3, 5, 7, 11), jnp.float32),
              ((2, 8, 72, 72), jnp.float32),
              ((2, 4, 16, 16), jnp.bfloat16)]
    for shape, dt in checks:
        key, sub = jax.random.split(key)
        xt = (jax.random.normal(sub, shape, dtype=jnp.float32) * 4.0).astype(dt)
        ot = jax.block_until_ready(
            learned_clipped_linear_quantization(
                xt, clip_val, num_bits=num_bits, dequantize=True))
        rt = _reference(xt, clip_val, num_bits, dequantize=True)
        assert ot.shape == xt.shape and ot.dtype == xt.dtype
        assert jnp.allclose(ot.astype(jnp.float32), rt.astype(jnp.float32),
                            atol=1e-5, rtol=1e-5), f"mismatch {shape} {dt}"

    print("KERNEL_OK")
</pallas_src>

<mosaic_0001>
module attributes {stable_mosaic.version = 11 : i64} {
  func.func @_pact_quant_kernel(%arg0: i32, %arg1: memref<2xf32, #tpu.memory_space<smem>>, %arg2: memref<2x1024xf32, #tpu.memory_space<vmem>>, %arg3: memref<2x1024xf32, #tpu.memory_space<vmem>>) attributes {dimension_semantics = [#tpu.dimension_semantics<parallel>], iteration_bounds = array<i64: 1>, scalar_prefetch = 0 : i64, scratch_operands = 0 : i64, tpu.core_type = #tpu.core_type<tc>, window_params = [{transform_indices = @transform_0, window_bounds = array<i64: 2>}, {transform_indices = @transform_1, window_bounds = array<i64: 2, 1024>}, {transform_indices = @transform_2, window_bounds = array<i64: 2, 1024>}]} {
    %c0 = arith.constant 0 : index
    %0 = memref.load %arg1[%c0] : memref<2xf32, #tpu.memory_space<smem>>
    %c1 = arith.constant 1 : index
    %1 = memref.load %arg1[%c1] : memref<2xf32, #tpu.memory_space<smem>>
    %c0_0 = arith.constant 0 : index
    %c0_1 = arith.constant 0 : index
    %2 = vector.load %arg2[%c0_0, %c0_1] : memref<2x1024xf32, #tpu.memory_space<vmem>>, vector<2x1024xf32>
    %cst = arith.constant 0.000000e+00 : f32
    %3 = vector.broadcast %cst : f32 to vector<2x1024xf32>
    %4 = arith.maximumf %2, %3 : vector<2x1024xf32>
    %5 = vector.broadcast %0 : f32 to vector<2x1024xf32>
    %6 = arith.minimumf %4, %5 : vector<2x1024xf32>
    %7 = vector.broadcast %1 : f32 to vector<2x1024xf32>
    %8 = arith.mulf %6, %7 : vector<2x1024xf32>
    %9 = math.roundeven %8 : vector<2x1024xf32>
    %10 = vector.broadcast %1 : f32 to vector<2x1024xf32>
    %11 = arith.divf %9, %10 : vector<2x1024xf32>
    %c0_2 = arith.constant 0 : index
    %c0_3 = arith.constant 0 : index
    %12 = vector.load %arg3[%c0_2, %c0_3] : memref<2x1024xf32, #tpu.memory_space<vmem>>, vector<2x1024xf32>
    tpu.vector_store %arg3[%c0_2, %c0_3], %11 {strides = array<i32>} : memref<2x1024xf32, #tpu.memory_space<vmem>>, vector<2x1024xf32>,
    return
  }
  func.func @transform_0(%arg0: i32) -> i32 {
    %c0_i32 = arith.constant 0 : i32
    %c0_i32_0 = arith.constant 0 : i32
    return %c0_i32 : i32
  }
  func.func @transform_1(%arg0: i32) -> (i32, i32) {
    %c0_i32 = arith.constant 0 : i32
    %c0_i32_0 = arith.constant 0 : i32
    return %arg0, %c0_i32 : i32, i32
  }
  func.func @transform_2(%arg0: i32) -> (i32, i32) {
    %c0_i32 = arith.constant 0 : i32
    %c0_i32_0 = arith.constant 0 : i32
    return %arg0, %c0_i32 : i32, i32
  }
}

</mosaic_0001>

<bundles_post_ra>
// kernel: learned_clipped_linear_quantization.1
= control target key start
LH: loop header
LB: loop body
LE: loop exit
PB: predicated region body
PF: predicated region fallthrough
CT: control target
= control target key end

     0   :  { %7 = vsyncpa [#allocation3], 0  ;;  %s99_s0 = inlined_call_operand.vmem [shape: f32[2], index: 0, kind: input, shape index: {}]   ;;  %s100_s1 = inlined_call_operand.vmem [shape: f32[2,1024], index: 1, kind: input, shape index: {}]   ;;  %s101_s2 = inlined_call_operand.vmem [shape: f32[2,1024], index: 2, kind: output, shape index: {}]  }
   0x1   :  { %s14_s11 = sshll.u32 %s99_s0, 4  ;;  %s15_s11 = int_to_ptr.vmem [resolvable:$true] %s14_s11 }
   0x2   :  { %s54_s12 = scalar_lea.vmem %s15_s11, 16  ;;  %p59_p1 = scmp.lt.s32.totalorder %s15_s11, %s15_s11 }
   0x3   :  { %p55_p0 = scmp.ne.s32.totalorder %s15_s11, %s54_s12  ;;  %p60_p2 = scmp.lt.s32.totalorder %s54_s12, %s54_s12 }
   0x5   :  { %p61_p3 = por %p60_p2, %p59_p1 }
   0x7   :  { %p62_p4 = pnand %p61_p3, %p55_p0 }
   0x9   :  { %65 = shalt.err (!%p62_p4)
}
   0xa   :  { %s68_s13 = smov [#allocation2]  }
   0xb   :  { %17 = dma.vmem_to_smem %s15_s11, 16, %s68_s13, [#allocation3]  }
   0xc   :  { %66 = dma.done.wait [#allocation3], 16  }
   0xd   :  { %67 = vsyncadd [#allocation3], 4294967280 }
   0xe   :  { %23 = sfence }
   0xf   :  { %s24_s14 = sld [smem:[#allocation2]]  ;;  %s48_s15 = sld [smem:[#allocation2 + $0x1]]  ;;  %v26_v0 = vld [vmem:[%s100_s1] sm:$0xff]  ;;  %v27_v1 = vld [vmem:[%s100_s1 + $0x8] sm:$0xff] }
  0x10   :  { %v28_v2 = vmax.f32 %v26_v0, 0.0  ;;  %v29_v3 = vmax.f32 %v27_v1, 0.0 }
  0x15   :  { %v30_v4 = vstv %s24_s14  ;;  %v33_v5 = vstv %s48_s15 }
  0x16   :  { %v31_v6 = vmin.f32 %v28_v2, %v30_v4  ;;  %52 = vrcp.f32 %v33_v5  ;;  %v32_v7 = vmin.f32 %v29_v3, %v30_v4 }
  0x18   :  { %v34_v8 = vmul.f32 %v33_v5, %v31_v6  ;;  %v35_v9 = vmul.f32 %v33_v5, %v32_v7 }
  0x1a   :  { %v49_v10 = vround.rtne.f32 %v34_v8  ;;  %v50_v11 = vround.rtne.f32 %v35_v9 }
  0x20   :  { %v53_v12 = vpop.eup %52 }
  0x21   :  { %v39_v13 = vmul.f32 %v53_v12, %v49_v10  ;;  %v40_v14 = vmul.f32 %v53_v12, %v50_v11 }
  0x23   :  { %41 = vst [vmem:[%s101_s2] sm:$0xff] %v39_v13  ;;  %42 = vst [vmem:[%s101_s2 + $0x8] sm:$0xff] %v40_v14 }
  0x24   :  { %47 = vsyncpa [#allocation3], 1 }

</bundles_post_ra>
